<compile_context>
chip_gen: v7x
topology: tpu7x:2x2x1
jax: 0.10.0
libtpu: 0.0.40
codegen_flags: <defaults>
</compile_context>

<pallas_src>
import functools

import jax
import jax.numpy as jnp
from jax.experimental import pallas as pl
from jax.experimental.pallas import tpu as pltpu


def _tv_kernel(x_ref, partial_ref, *, h, w):
    """One grid step: TV partial sum over a (tile_nc, H, W) slab of images."""
    # f32 compute keeps v5e (no bf16 VPU) correct; for f32 inputs this is a no-op.
    x = x_ref[...].astype(jnp.float32)  # (tile_nc, H, W)

    # Neighbour values via XLU rotates.  roll by (size-1) == roll by -1, i.e.
    # position i holds x[i+1] (wrapping at the last row/column).
    x_down = pltpu.roll(x, shift=h - 1, axis=1)   # x[:, i+1, :] at row i
    x_right = pltpu.roll(x, shift=w - 1, axis=2)  # x[:, :, j+1] at col j

    # Mask out the wrap-around row / column before summing.
    h_idx = jax.lax.broadcasted_iota(jnp.int32, x.shape, 1)
    w_idx = jax.lax.broadcasted_iota(jnp.int32, x.shape, 2)
    tv = (jnp.where(h_idx < h - 1, jnp.abs(x_down - x), 0.0)
          + jnp.where(w_idx < w - 1, jnp.abs(x_right - x), 0.0))

    # Per-step partial sum, broadcast into a fully aligned (1, 8, 128) tile
    # (lane-dense, no masked stores); wrapper reads [:, 0, 0].
    partial_ref[...] = jnp.full(partial_ref.shape, jnp.sum(tv), dtype=jnp.float32)


def tv_loss_forward(x, strength):
    """Returns (input_passthrough, loss) with
       loss = strength / numel(x) * (sum|dH| + sum|dW|)."""
    n, c, h, w = x.shape
    nc = n * c
    # Diffs are intra-image along H and W only, so fusing N*C is exact and
    # needs no halo.  NCHW-contiguous -> this reshape is metadata only.
    x3 = x.reshape(nc, h, w)

    # Pick the largest divisor of N*C whose input block fits a ~2 MiB budget:
    # double-buffered input + a few f32 temporaries stays far under the scoped
    # VMEM limit on v5e (16 MiB default), v6e (32 MiB) and v7x (64 MiB phys).
    bytes_per_img = h * w * x.dtype.itemsize
    budget = 2 * 1024 * 1024
    tile_nc = 1
    for d in range(nc, 0, -1):
        if nc % d == 0 and d * bytes_per_img <= budget:
            tile_nc = d
            break
    # Note: for single images larger than the budget (huge H*W) an H-slab
    # tiling with a 1-row halo would be the next step; not needed at these sizes.
    grid_sz = nc // tile_nc

    partials = pl.pallas_call(
        functools.partial(_tv_kernel, h=h, w=w),
        out_shape=jax.ShapeDtypeStruct((grid_sz, 8, 128), jnp.float32),
        grid_spec=pltpu.PrefetchScalarGridSpec(
            num_scalar_prefetch=0,
            grid=(grid_sz,),
            in_specs=[pl.BlockSpec((tile_nc, h, w), lambda g: (g, 0, 0))],
            out_specs=pl.BlockSpec((1, 8, 128), lambda g: (g, 0, 0)),
        ),
        compiler_params=pltpu.CompilerParams(
            # Independent per-step partials -> safe to shard across TCs (v7x).
            dimension_semantics=("parallel",),
            vmem_limit_bytes=48 * 1024 * 1024,
        ),
    )(x3)

    scale = float(strength) / float(x.size)
    loss = jnp.sum(partials[:, 0, 0]) * scale
    # Forward is an identity on the tensor: return the input untouched
    # (no kernel-side copy -> half the HBM traffic).
    return x, loss


def tv_loss_ref(x, strength):
    xf = x.astype(jnp.float32)
    x_diff = xf[:, :, 1:, :] - xf[:, :, :-1, :]
    y_diff = xf[:, :, :, 1:] - xf[:, :, :, :-1]
    return strength / x.size * (jnp.sum(jnp.abs(x_diff)) + jnp.sum(jnp.abs(y_diff)))


if __name__ == "__main__":
    key = jax.random.PRNGKey(0)
    strength = 1e-3
    x = jax.random.normal(key, (2, 4, 16, 16), dtype=jnp.float32)

    out, loss = tv_loss_forward(x, strength)
    out = jax.block_until_ready(out)
    loss = jax.block_until_ready(loss)

    # correctness checks
    assert out.shape == x.shape and out.dtype == x.dtype
    assert jnp.allclose(out, x), "pass-through output mismatch"
    ref = tv_loss_ref(x, strength)
    assert jnp.allclose(loss, ref, rtol=1e-5, atol=1e-7), (loss, ref)

    print("KERNEL_OK")
</pallas_src>

<mosaic_0001>
module attributes {stable_mosaic.version = 11 : i64} {
  func.func @_tv_kernel(%arg0: i32, %arg1: memref<8x16x16xf32, #tpu.memory_space<vmem>>, %arg2: memref<1x8x128xf32, #tpu.memory_space<vmem>>) attributes {dimension_semantics = [#tpu.dimension_semantics<parallel>], iteration_bounds = array<i64: 1>, scalar_prefetch = 0 : i64, scratch_operands = 0 : i64, tpu.core_type = #tpu.core_type<tc>, window_params = [{transform_indices = @transform_0, window_bounds = array<i64: 8, 16, 16>}, {transform_indices = @transform_1, window_bounds = array<i64: 1, 8, 128>}]} {
    %c0 = arith.constant 0 : index
    %c0_0 = arith.constant 0 : index
    %c0_1 = arith.constant 0 : index
    %0 = vector.load %arg1[%c0, %c0_0, %c0_1] : memref<8x16x16xf32, #tpu.memory_space<vmem>>, vector<8x16x16xf32>
    %c15_i32 = arith.constant 15 : i32
    %1 = tpu.dynamic_rotate %0 by %c15_i32 dim 1 : vector<8x16x16xf32>, i32 -> vector<8x16x16xf32>
    %c15_i32_2 = arith.constant 15 : i32
    %2 = tpu.dynamic_rotate %0 by %c15_i32_2 dim 2 : vector<8x16x16xf32>, i32 -> vector<8x16x16xf32>
    %3 = tpu.iota {dimensions = array<i32: 1>} : vector<8x16x16xi32>
    %4 = tpu.iota {dimensions = array<i32: 2>} : vector<8x16x16xi32>
    %c15_i32_3 = arith.constant 15 : i32
    %5 = vector.broadcast %c15_i32_3 : i32 to vector<8x16x16xi32>
    %6 = arith.cmpi slt, %3, %5 : vector<8x16x16xi32>
    %7 = arith.subf %1, %0 : vector<8x16x16xf32>
    %8 = math.absf %7 : vector<8x16x16xf32>
    %cst = arith.constant 0.000000e+00 : f32
    %9 = vector.broadcast %cst : f32 to vector<8x16x16xf32>
    %10 = arith.select %6, %8, %9 : vector<8x16x16xi1>, vector<8x16x16xf32>
    %c15_i32_4 = arith.constant 15 : i32
    %11 = vector.broadcast %c15_i32_4 : i32 to vector<8x16x16xi32>
    %12 = arith.cmpi slt, %4, %11 : vector<8x16x16xi32>
    %13 = arith.subf %2, %0 : vector<8x16x16xf32>
    %14 = math.absf %13 : vector<8x16x16xf32>
    %cst_5 = arith.constant 0.000000e+00 : f32
    %15 = vector.broadcast %cst_5 : f32 to vector<8x16x16xf32>
    %16 = arith.select %12, %14, %15 : vector<8x16x16xi1>, vector<8x16x16xf32>
    %17 = arith.addf %10, %16 : vector<8x16x16xf32>
    %18 = vector.shape_cast %17 : vector<8x16x16xf32> to vector<1x8x16x16xf32>
    %cst_6 = arith.constant dense<0.000000e+00> : vector<1xf32>
    %19 = vector.multi_reduction <add>, %18, %cst_6 [1, 2, 3] : vector<1x8x16x16xf32> to vector<1xf32>
    %20 = vector.shape_cast %19 : vector<1xf32> to vector<1x1x1x1xf32>
    %21 = vector.extract %20[0, 0, 0, 0] : f32 from vector<1x1x1x1xf32>
    %22 = vector.broadcast %21 : f32 to vector<1x8x128xf32>
    %c0_7 = arith.constant 0 : index
    %c0_8 = arith.constant 0 : index
    %c0_9 = arith.constant 0 : index
    %23 = vector.load %arg2[%c0_7, %c0_8, %c0_9] : memref<1x8x128xf32, #tpu.memory_space<vmem>>, vector<1x8x128xf32>
    tpu.vector_store %arg2[%c0_7, %c0_8, %c0_9], %22 {strides = array<i32>} : memref<1x8x128xf32, #tpu.memory_space<vmem>>, vector<1x8x128xf32>,
    return
  }
  func.func @transform_0(%arg0: i32) -> (i32, i32, i32) {
    %c0_i32 = arith.constant 0 : i32
    %c0_i32_0 = arith.constant 0 : i32
    %c0_i32_1 = arith.constant 0 : i32
    return %arg0, %c0_i32, %c0_i32_0 : i32, i32, i32
  }
  func.func @transform_1(%arg0: i32) -> (i32, i32, i32) {
    %c0_i32 = arith.constant 0 : i32
    %c0_i32_0 = arith.constant 0 : i32
    %c0_i32_1 = arith.constant 0 : i32
    return %arg0, %c0_i32, %c0_i32_0 : i32, i32, i32
  }
}

</mosaic_0001>

<bundles_post_ra>
// kernel: tpu_custom_call.1
= control target key start
LH: loop header
LB: loop body
LE: loop exit
PB: predicated region body
PF: predicated region fallthrough
CT: control target
= control target key end

     0   :  { %6 = vsyncpa [#allocation3], 0  ;;  %s903_s0 = inlined_call_operand.hbm [shape: f32[8,16,16], index: 0, kind: input, shape index: {}]   ;;  %s904_s1 = inlined_call_operand.hbm [shape: f32[1,8,128], index: 1, kind: output, shape index: {}]  }
   0x1   :  { %7 = vsyncpa [#allocation4], 0  ;;  %s532_s6 = smov [#allocation2]   ;;  %s484_s10 = scalar_lea.hbm %s903_s0, 2048 }
   0x2   :  { %s13_s7 = sshll.u32 %s532_s6, 4  ;;  %p485_p0 = scmp.ne.s32.totalorder %s903_s0, %s484_s10  ;;  %s14_s7 = int_to_ptr.vmem [resolvable:$true] %s13_s7 }
   0x3   :  { %p488_p1 = scmp.lt.u32.totalorder %s484_s10, %s903_s0 }
   0x5   :  { %p490_p2 = pnand %p488_p1, %p485_p0 }
   0x7   :  { %493 = shalt.err (!%p490_p2)
}
   0x8   :  { %s494_s15 = scalar_lea.vmem %s14_s7, 2048  ;;  %p499_p4 = scmp.lt.s32.totalorder %s14_s7, %s14_s7 }
   0x9   :  { %p495_p3 = scmp.ne.s32.totalorder %s14_s7, %s494_s15  ;;  %p500_p5 = scmp.lt.s32.totalorder %s494_s15, %s494_s15 }
   0xb   :  { %p501_p6 = por %p500_p5, %p499_p4 }
   0xd   :  { %p502_p7 = pnand %p501_p6, %p495_p3 }
   0xf   :  { %505 = shalt.err (!%p502_p7)
}
  0x10   :  { %s533_s16 = smov 128   ;;  %s534_s17 = smov 8  }
  0x11   :  { %19 = dma.hbm_to_vmem [thread:$0]  %s903_s0, 2048, %s14_s7, [#allocation3], %s533_s16, %s533_s16, %s534_s17  }
  0x12   :  { %528 = dma.done.wait [#allocation3], 2048  }
  0x13   :  { %529 = vsyncadd [#allocation3], 4294965248  ;;  %v561_v0 = vld [vmem:[#allocation2] sm:$0xff]  ;;  %v563_v1 = vld [vmem:[#allocation2 + $0x10] sm:$0xff]  ;;  %s535_s20 = smov 16   ;;  %s536_s0 = smov 1  }
  0x14   :  { %75 = vrot.lane.b32.xlu0 %v561_v0, %s535_s20  ;;  %81 = vrot.lane.b32.xlu1 %v563_v1, %s535_s20  ;;  %v569_v2 = vld [vmem:[#allocation2 + $0x8] sm:$0xff]  ;;  %v571_v3 = vld [vmem:[#allocation2 + $0x18] sm:$0xff]  ;;  %v577_v4 = vld [vmem:[#allocation2 + $0x20] sm:$0xff]  ;;  %vm74_vm0 = vcmask 1047680   ;;  %s537_s21 = smov 127   ;;  %vm417_vm4 = vcmask 130048  }
  0x15   :  { %v579_v5 = vld [vmem:[#allocation2 + $0x28] sm:$0xff]  ;;  %v585_v6 = vld [vmem:[#allocation2 + $0x30] sm:$0xff]  ;;  %v587_v7 = vld [vmem:[#allocation2 + $0x38] sm:$0xff]  ;;  %s538_s22 = smov [#allocation5]  }
  0x16   :  { %v593_v8 = vld [vmem:[#allocation2 + $0x40] sm:$0xff]  ;;  %v595_v9 = vld [vmem:[#allocation2 + $0x48] sm:$0xff]  ;;  %v601_v10 = vld [vmem:[#allocation2 + $0x50] sm:$0xff]  ;;  %s466_s23 = sshll.u32 %s538_s22, 4  ;;  %s467_s23 = int_to_ptr.vmem [resolvable:$true] %s466_s23 }
  0x17   :  { %v603_v11 = vld [vmem:[#allocation2 + $0x58] sm:$0xff]  ;;  %v609_v12 = vld [vmem:[#allocation2 + $0x60] sm:$0xff]  ;;  %v611_v13 = vld [vmem:[#allocation2 + $0x68] sm:$0xff]  ;;  %s506_s25 = scalar_lea.vmem %s467_s23, 128  ;;  %p511_p9 = scmp.lt.s32.totalorder %s467_s23, %s467_s23 }
  0x18   :  { %78 = vrot.lane.b32.xlu0 %v569_v2, %s535_s20  ;;  %84 = vrot.lane.b32.xlu1 %v571_v3, %s535_s20  ;;  %v617_v14 = vld [vmem:[#allocation2 + $0x70] sm:$0xff]  ;;  %v619_v15 = vld [vmem:[#allocation2 + $0x78] sm:$0xff]  ;;  %p507_p8 = scmp.ne.s32.totalorder %s467_s23, %s506_s25  ;;  %p512_p10 = scmp.lt.s32.totalorder %s506_s25, %s506_s25 }
  0x1a   :  { %p513_p11 = por %p512_p10, %p511_p9 }
  0x1c   :  { %87 = vrot.lane.b32.xlu0 %v577_v4, %s535_s20  ;;  %90 = vrot.lane.b32.xlu1 %v579_v5, %s535_s20  ;;  %p514_p12 = pnand %p513_p11, %p507_p8 }
  0x20   :  { %93 = vrot.lane.b32.xlu0 %v585_v6, %s535_s20  ;;  %96 = vrot.lane.b32.xlu1 %v587_v7, %s535_s20 }
  0x24   :  { %99 = vrot.lane.b32.xlu0 %v593_v8, %s535_s20  ;;  %102 = vrot.lane.b32.xlu1 %v595_v9, %s535_s20 }
  0x28   :  { %105 = vrot.lane.b32.xlu0 %v601_v10, %s535_s20  ;;  %108 = vrot.lane.b32.xlu1 %v603_v11, %s535_s20 }
  0x2c   :  { %111 = vrot.lane.b32.xlu0 %v609_v12, %s535_s20  ;;  %114 = vrot.lane.b32.xlu1 %v611_v13, %s535_s20 }
  0x30   :  { %117 = vrot.lane.b32.xlu0 %v617_v14, %s535_s20  ;;  %120 = vrot.lane.b32.xlu1 %v619_v15, %s535_s20 }
  0x34   :  { %243 = vrot.lane.b32.xlu1 %v569_v2, %s536_s0  ;;  %241 = vrot.lane.b32.xlu0 %v561_v0, %s536_s0 }
  0x38   :  { %245 = vrot.lane.b32.xlu1 %v563_v1, %s536_s0 }
  0x3c   :  { %247 = vrot.lane.b32.xlu1 %v571_v3, %s536_s0 }
  0x40   :  { %249 = vrot.lane.b32.xlu1 %v577_v4, %s536_s0 }
  0x44   :  { %251 = vrot.lane.b32.xlu1 %v579_v5, %s536_s0 }
  0x48   :  { %253 = vrot.lane.b32.xlu1 %v585_v6, %s536_s0 }
  0x4c   :  { %255 = vrot.lane.b32.xlu1 %v587_v7, %s536_s0 }
  0x86   :  { %v76_v16 = vpop.permute.xlu0 %75  ;;  %v82_v17 = vpop.permute.xlu1 %81 }
  0x87   :  { %v77_v18 = vsel %vm74_vm0, %v76_v16, %v561_v0  ;;  %v83_v19 = vsel %vm74_vm0, %v82_v17, %v563_v1 }
  0x88   :  { %123 = vrot.lane.b32.xlu0 %v77_v18, %s535_s20 }
  0x8a   :  { %v79_v20 = vpop.permute.xlu0 %78  ;;  %v85_v21 = vpop.permute.xlu1 %84 }
  0x8b   :  { %v80_v22 = vsel %vm74_vm0, %v79_v20, %v569_v2  ;;  %v86_v23 = vsel %vm74_vm0, %v85_v21, %v571_v3 }
  0x8c   :  { %127 = vrot.lane.b32.xlu0 %v83_v19, %s535_s20  ;;  %125 = vrot.lane.b32.xlu1 %v80_v22, %s535_s20 }
  0x8e   :  { %v88_v24 = vpop.permute.xlu0 %87  ;;  %v91_v26 = vpop.permute.xlu1 %90 }
  0x8f   :  { %v89_v25 = vsel %vm74_vm0, %v88_v24, %v577_v4  ;;  %v92_v27 = vsel %vm74_vm0, %v91_v26, %v579_v5 }
  0x90   :  { %129 = vrot.lane.b32.xlu0 %v86_v23, %s535_s20  ;;  %257 = vrot.lane.b32.xlu1 %v593_v8, %s536_s0 }
  0x92   :  { %v94_v28 = vpop.permute.xlu0 %93  ;;  %v97_v30 = vpop.permute.xlu1 %96 }
  0x93   :  { %v95_v29 = vsel %vm74_vm0, %v94_v28, %v585_v6  ;;  %v98_v31 = vsel %vm74_vm0, %v97_v30, %v587_v7 }
  0x94   :  { %131 = vrot.lane.b32.xlu0 %v89_v25, %s535_s20  ;;  %259 = vrot.lane.b32.xlu1 %v595_v9, %s536_s0 }
  0x96   :  { %v100_v32 = vpop.permute.xlu0 %99  ;;  %v103_v34 = vpop.permute.xlu1 %102 }
  0x97   :  { %v101_v33 = vsel %vm74_vm0, %v100_v32, %v593_v8  ;;  %v104_v35 = vsel %vm74_vm0, %v103_v34, %v595_v9 }
  0x98   :  { %133 = vrot.lane.b32.xlu0 %v92_v27, %s535_s20  ;;  %261 = vrot.lane.b32.xlu1 %v601_v10, %s536_s0 }
  0x9a   :  { %v106_v36 = vpop.permute.xlu0 %105  ;;  %v109_v38 = vpop.permute.xlu1 %108 }
  0x9b   :  { %v107_v37 = vsel %vm74_vm0, %v106_v36, %v601_v10  ;;  %v110_v39 = vsel %vm74_vm0, %v109_v38, %v603_v11 }
  0x9c   :  { %135 = vrot.lane.b32.xlu0 %v95_v29, %s535_s20  ;;  %263 = vrot.lane.b32.xlu1 %v603_v11, %s536_s0 }
  0x9e   :  { %v112_v40 = vpop.permute.xlu0 %111  ;;  %v115_v42 = vpop.permute.xlu1 %114 }
  0x9f   :  { %v113_v41 = vsel %vm74_vm0, %v112_v40, %v609_v12  ;;  %v116_v43 = vsel %vm74_vm0, %v115_v42, %v611_v13 }
  0xa0   :  { %137 = vrot.lane.b32.xlu0 %v98_v31, %s535_s20  ;;  %265 = vrot.lane.b32.xlu1 %v609_v12, %s536_s0 }
  0xa2   :  { %v118_v44 = vpop.permute.xlu0 %117  ;;  %v121_v46 = vpop.permute.xlu1 %120 }
  0xa3   :  { %v119_v45 = vsel %vm74_vm0, %v118_v44, %v617_v14  ;;  %v122_v47 = vsel %vm74_vm0, %v121_v46, %v619_v15 }
  0xa4   :  { %139 = vrot.lane.b32.xlu0 %v101_v33, %s535_s20  ;;  %267 = vrot.lane.b32.xlu1 %v611_v13, %s536_s0 }
  0xa6   :  { %v244_v48 = vpop.permute.xlu1 %243  ;;  %v242_v54 = vpop.permute.xlu0 %241 }
  0xa8   :  { %141 = vrot.lane.b32.xlu0 %v104_v35, %s535_s20  ;;  %269 = vrot.lane.b32.xlu1 %v617_v14, %s536_s0 }
  0xaa   :  { %v246_v49 = vpop.permute.xlu1 %245 }
  0xac   :  { %143 = vrot.lane.b32.xlu0 %v107_v37, %s535_s20  ;;  %271 = vrot.lane.b32.xlu1 %v619_v15, %s536_s0 }
  0xae   :  { %v248_v50 = vpop.permute.xlu1 %247 }
  0xb0   :  { %145 = vrot.lane.b32.xlu0 %v110_v39, %s535_s20 }
  0xb2   :  { %v250_v51 = vpop.permute.xlu1 %249 }
  0xb4   :  { %147 = vrot.lane.b32.xlu0 %v113_v41, %s535_s20 }
  0xb6   :  { %v252_v52 = vpop.permute.xlu1 %251 }
  0xb8   :  { %149 = vrot.lane.b32.xlu0 %v116_v43, %s535_s20 }
  0xba   :  { %v254_v53 = vpop.permute.xlu1 %253 }
  0xbc   :  { %151 = vrot.lane.b32.xlu0 %v119_v45, %s535_s20 }
  0xbe   :  { %v256_v55 = vpop.permute.xlu1 %255 }
  0xc0   :  { %153 = vrot.lane.b32.xlu0 %v122_v47, %s535_s20 }
  0xfa   :  { %v124_v56 = vpop.permute.xlu0 %123 }
  0xfb   :  { %v155_v57 = vsel %vm74_vm0, %v124_v56, %v561_v0 }
  0xfc   :  { %v289_v58 = vsub.f32 %v155_v57, %v242_v54 }
  0xfe   :  { %v305_v59 = vand.u32 2147483647, %v289_v58  ;;  %v126_v60 = vpop.permute.xlu1 %125  ;;  %v128_v61 = vpop.permute.xlu0 %127 }
  0xff   :  { %v156_v62 = vsel %vm74_vm0, %v126_v60, %v569_v2  ;;  %v157_v63 = vsel %vm74_vm0, %v128_v61, %v563_v1 }
 0x100   :  { %v290_v16 = vsub.f32 %v156_v62, %v244_v48  ;;  %v291_v17 = vsub.f32 %v157_v63, %v246_v49  ;;  %337 = vrot.lane.b32.xlu0 %v305_v59, %s537_s21 }
 0x102   :  { %v306_v18 = vand.u32 2147483647, %v290_v16  ;;  %v307_v19 = vand.u32 2147483647, %v291_v17  ;;  %v130_v20 = vpop.permute.xlu0 %129  ;;  %v258_v26 = vpop.permute.xlu1 %257 }
 0x103   :  { %v158_v21 = vsel %vm74_vm0, %v130_v20, %v571_v3 }
 0x104   :  { %v292_v22 = vsub.f32 %v158_v21, %v248_v50  ;;  %339 = vrot.lane.b32.xlu1 %v306_v18, %s537_s21  ;;  %341 = vrot.lane.b32.xlu0 %v307_v19, %s537_s21 }
 0x106   :  { %v308_v23 = vand.u32 2147483647, %v292_v22  ;;  %v132_v24 = vpop.permute.xlu0 %131  ;;  %v260_v32 = vpop.permute.xlu1 %259 }
 0x107   :  { %v159_v25 = vsel %vm74_vm0, %v132_v24, %v577_v4 }
 0x108   :  { %v293_v27 = vsub.f32 %v159_v25, %v250_v51  ;;  %343 = vrot.lane.b32.xlu1 %v308_v23, %s537_s21 }
 0x10a   :  { %v309_v28 = vand.u32 2147483647, %v293_v27  ;;  %v134_v29 = vpop.permute.xlu0 %133  ;;  %v262_v40 = vpop.permute.xlu1 %261 }
 0x10b   :  { %v160_v30 = vsel %vm74_vm0, %v134_v29, %v579_v5 }
 0x10c   :  { %v294_v31 = vsub.f32 %v160_v30, %v252_v52  ;;  %345 = vrot.lane.b32.xlu0 %v309_v28, %s537_s21 }
 0x10e   :  { %v310_v33 = vand.u32 2147483647, %v294_v31  ;;  %v136_v34 = vpop.permute.xlu0 %135  ;;  %v264_v46 = vpop.permute.xlu1 %263 }
 0x10f   :  { %v161_v35 = vsel %vm74_vm0, %v136_v34, %v585_v6  ;;  %v47_v34 = vrot.slane %v569_v2, 1 }
 0x110   :  { %v295_v36 = vsub.f32 %v161_v35, %v254_v53  ;;  %347 = vrot.lane.b32.xlu1 %v310_v33, %s537_s21  ;;  %v39_v35 = vrot.slane %v561_v0, 1 }
 0x112   :  { %v311_v37 = vand.u32 2147483647, %v295_v36  ;;  %v138_v38 = vpop.permute.xlu0 %137  ;;  %v266_v54 = vpop.permute.xlu1 %265 }
 0x113   :  { %v162_v39 = vsel %vm74_vm0, %v138_v38, %v587_v7 }
 0x114   :  { %v296_v41 = vsub.f32 %v162_v39, %v256_v55  ;;  %349 = vrot.lane.b32.xlu0 %v311_v37, %s537_s21  ;;  %v40_v39 = vrot.slane %v563_v1, 1 }
 0x116   :  { %v312_v42 = vand.u32 2147483647, %v296_v41  ;;  %v140_v43 = vpop.permute.xlu0 %139  ;;  %v268_v60 = vpop.permute.xlu1 %267 }
 0x117   :  { %v163_v44 = vsel %vm74_vm0, %v140_v43, %v593_v8 }
 0x118   :  { %v297_v45 = vsub.f32 %v163_v44, %v258_v26  ;;  %351 = vrot.lane.b32.xlu1 %v312_v42, %s537_s21 }
 0x11a   :  { %v313_v47 = vand.u32 2147483647, %v297_v45  ;;  %v142_v48 = vpop.permute.xlu0 %141  ;;  %v270_v20 = vpop.permute.xlu1 %269  ;;  %v41_v45 = vrot.slane %v577_v4, 1 }
 0x11b   :  { %v164_v49 = vsel %vm74_vm0, %v142_v48, %v595_v9 }
 0x11c   :  { %v298_v50 = vsub.f32 %v164_v49, %v260_v32  ;;  %353 = vrot.lane.b32.xlu0 %v313_v47, %s537_s21  ;;  %v55_v32 = vlaneseq }
 0x11e   :  { %v314_v51 = vand.u32 2147483647, %v298_v50  ;;  %v144_v52 = vpop.permute.xlu0 %143  ;;  %v272_v26 = vpop.permute.xlu1 %271  ;;  %v753_v33 = vshrl.u32 %v55_v32, 7  ;;  %v766_v41 = vand.u32 127, %v55_v32 }
 0x11f   :  { %v165_v53 = vsel %vm74_vm0, %v144_v52, %v601_v10 }
 0x120   :  { %v299_v55 = vsub.f32 %v165_v53, %v262_v40  ;;  %355 = vrot.lane.b32.xlu1 %v314_v51, %s537_s21  ;;  %vm57_vm1 = vcmp.lt.s32.totalorder %v753_v33, 7  ;;  %v762_v38 = vadd.s32 8, %v753_v33  ;;  %v48_v40 = vrot.slane %v571_v3, 1 }
 0x121   :  { %v66_v36 = vsel %vm57_vm1, %v47_v34, %v39_v35  ;;  %v58_v42 = vsel %vm57_vm1, %v39_v35, %v47_v34  ;;  %vm224_vm3 = vcmp.lt.s32.totalorder %v766_v41, 15  ;;  %v44_v35 = vrot.slane %v601_v10, 1 }
 0x122   :  { %v315_v56 = vand.u32 2147483647, %v299_v55  ;;  %v146_v57 = vpop.permute.xlu0 %145  ;;  %v177_v37 = vsub.f32 %v66_v36, %v569_v2  ;;  %v67_v44 = vsel %vm57_vm1, %v48_v40, %v40_v39  ;;  %v49_v2 = vrot.slane %v579_v5, 1 }
 0x123   :  { %v166_v58 = vsel %vm74_vm0, %v146_v57, %v603_v11  ;;  %vm175_vm2 = vcmp.lt.s32.totalorder %v762_v38, 15  ;;  %v176_v47 = vsub.f32 %v58_v42, %v561_v0  ;;  %v59_v49 = vsel %vm57_vm1, %v40_v39, %v48_v40 }
 0x124   :  { %v300_v59 = vsub.f32 %v166_v58, %v264_v46  ;;  %357 = vrot.lane.b32.xlu0 %v315_v56, %s537_s21  ;;  %v193_v43 = vand.u32 2147483647, %v177_v37  ;;  %v179_v50 = vsub.f32 %v67_v44, %v571_v3  ;;  %v60_v52 = vsel %vm57_vm1, %v41_v45, %v49_v2 }
 0x125   :  { %v68_v0 = vsel %vm57_vm1, %v49_v2, %v41_v45  ;;  %v50_v55 = vrot.slane %v587_v7, 1  ;;  %v192_v56 = vand.u32 2147483647, %v176_v47  ;;  %v178_v3 = vsub.f32 %v59_v49, %v563_v1 }
 0x126   :  { %v316_v61 = vand.u32 2147483647, %v300_v59  ;;  %v148_v62 = vpop.permute.xlu0 %147  ;;  %v209_v51 = vsel %vm175_vm2, %v193_v43, 0.0  ;;  %v195_v58 = vand.u32 2147483647, %v179_v50  ;;  %v180_v59 = vsub.f32 %v60_v52, %v577_v4 }
 0x127   :  { %v167_v63 = vsel %vm74_vm0, %v148_v62, %v609_v12  ;;  %v181_v62 = vsub.f32 %v68_v0, %v579_v5  ;;  %v52_v36 = vrot.slane %v603_v11, 1  ;;  %v45_v52 = vrot.slane %v609_v12, 1 }
 0x128   :  { %v301_v16 = vsub.f32 %v167_v63, %v266_v54  ;;  %359 = vrot.lane.b32.xlu1 %v316_v61, %s537_s21  ;;  %v42_v54 = vrot.slane %v585_v6, 1  ;;  %v43_v63 = vrot.slane %v593_v8, 1 }
 0x129   :  { %v71_v45 = vsel %vm57_vm1, %v52_v36, %v44_v35  ;;  %v63_v49 = vsel %vm57_vm1, %v44_v35, %v52_v36 }
 0x12a   :  { %v317_v17 = vand.u32 2147483647, %v301_v16  ;;  %v150_v18 = vpop.permute.xlu0 %149  ;;  %v51_v16 = vrot.slane %v595_v9, 1 }
 0x12b   :  { %v168_v19 = vsel %vm74_vm0, %v150_v18, %v611_v13 }
 0x12c   :  { %v302_v21 = vsub.f32 %v168_v19, %v268_v60  ;;  %361 = vrot.lane.b32.xlu0 %v317_v17, %s537_s21  ;;  %v61_v17 = vsel %vm57_vm1, %v42_v54, %v50_v55  ;;  %v194_v19 = vand.u32 2147483647, %v178_v3  ;;  %v70_v4 = vsel %vm57_vm1, %v51_v16, %v43_v63 }
 0x12e   :  { %v318_v22 = vand.u32 2147483647, %v302_v21  ;;  %v152_v23 = vpop.permute.xlu0 %151  ;;  %v211_v21 = vsel %vm175_vm2, %v195_v58, 0.0 }
 0x12f   :  { %v169_v24 = vsel %vm74_vm0, %v152_v23, %v617_v14  ;;  %v196_v23 = vand.u32 2147483647, %v180_v59 }
 0x130   :  { %v303_v25 = vsub.f32 %v169_v24, %v270_v20  ;;  %363 = vrot.lane.b32.xlu1 %v318_v22, %s537_s21  ;;  %v69_v20 = vsel %vm57_vm1, %v50_v55, %v42_v54  ;;  %v187_v55 = vsub.f32 %v71_v45, %v603_v11 }
 0x132   :  { %v319_v27 = vand.u32 2147483647, %v303_v25  ;;  %v154_v28 = vpop.permute.xlu0 %153  ;;  %v197_v25 = vand.u32 2147483647, %v181_v62  ;;  %v186_v62 = vsub.f32 %v63_v49, %v601_v10 }
 0x133   :  { %v170_v29 = vsel %vm74_vm0, %v154_v28, %v619_v15  ;;  %v183_v28 = vsub.f32 %v69_v20, %v587_v7  ;;  %v203_v20 = vand.u32 2147483647, %v187_v55 }
 0x134   :  { %v304_v30 = vsub.f32 %v170_v29, %v272_v26  ;;  %365 = vrot.lane.b32.xlu0 %v319_v27, %s537_s21  ;;  %v182_v26 = vsub.f32 %v61_v17, %v585_v6  ;;  %v62_v29 = vsel %vm57_vm1, %v43_v63, %v51_v16  ;;  %v213_v7 = vsel %vm175_vm2, %v197_v25, 0.0 }
 0x135   :  { %v199_v43 = vand.u32 2147483647, %v183_v28  ;;  %v184_v44 = vsub.f32 %v62_v29, %v593_v8  ;;  %v202_v25 = vand.u32 2147483647, %v186_v62 }
 0x136   :  { %v320_v31 = vand.u32 2147483647, %v304_v30  ;;  %v185_v30 = vsub.f32 %v70_v4, %v595_v9  ;;  %v198_v40 = vand.u32 2147483647, %v182_v26 }
 0x138   :  { %367 = vrot.lane.b32.xlu1 %v320_v31, %s537_s21 }
 0x172   :  { %v338_v46 = vpop.permute.xlu0 %337 }
 0x173   :  { %v385_v57 = vsel %vm224_vm3, %v338_v46, 0.0 }
 0x174   :  { %v401_v18 = vadd.f32 %v385_v57, %v192_v56  ;;  %v215_v56 = vsel %vm175_vm2, %v199_v43, 0.0 }
 0x176   :  { %v340_v48 = vpop.permute.xlu1 %339  ;;  %v342_v61 = vpop.permute.xlu0 %341  ;;  %v418_v31 = vsel %vm417_vm4, %v401_v18, 0.0 }
 0x177   :  { %v386_v53 = vsel %vm224_vm3, %v340_v48, 0.0  ;;  %v387_v5 = vsel %vm224_vm3, %v342_v61, 0.0  ;;  %v201_v48 = vand.u32 2147483647, %v185_v30 }
 0x178   :  { %v402_v60 = vadd.f32 %v386_v53, %v209_v51  ;;  %v403_v32 = vadd.f32 %v387_v5, %v194_v19  ;;  %v53_v53 = vrot.slane %v611_v13, 1 }
 0x179   :  { %v217_v16 = vsel %vm175_vm2, %v201_v48, 0.0 }
 0x17a   :  { %v344_v1 = vpop.permute.xlu1 %343  ;;  %v419_v22 = vsel %vm417_vm4, %v402_v60, 0.0  ;;  %v421_v2 = vsel %vm417_vm4, %v403_v32, 0.0  ;;  %v72_v57 = vsel %vm57_vm1, %v53_v53, %v45_v52  ;;  %v200_v60 = vand.u32 2147483647, %v184_v44 }
 0x17b   :  { %v388_v27 = vsel %vm224_vm3, %v344_v1, 0.0  ;;  %v420_v37 = vadd.f32 %v419_v22, %v418_v31  ;;  %v64_v17 = vsel %vm57_vm1, %v45_v52, %v53_v53  ;;  %v189_v4 = vsub.f32 %v72_v57, %v611_v13 }
 0x17c   :  { %v404_v39 = vadd.f32 %v388_v27, %v211_v21  ;;  %v46_v21 = vrot.slane %v617_v14, 1  ;;  %v54_v22 = vrot.slane %v619_v15, 1  ;;  %v188_v27 = vsub.f32 %v64_v17, %v609_v12 }
 0x17d   :  { %v422_v50 = vadd.f32 %v421_v2, %v420_v37  ;;  %v219_v31 = vsel %vm175_vm2, %v203_v20, 0.0  ;;  %v205_v35 = vand.u32 2147483647, %v189_v4 }
 0x17e   :  { %v346_v24 = vpop.permute.xlu0 %345  ;;  %v423_v8 = vsel %vm417_vm4, %v404_v39, 0.0  ;;  %v65_v36 = vsel %vm57_vm1, %v46_v21, %v54_v22 }
 0x17f   :  { %v389_v6 = vsel %vm224_vm3, %v346_v24, 0.0  ;;  %v424_v63 = vadd.f32 %v423_v8, %v422_v50  ;;  %v190_v44 = vsub.f32 %v65_v36, %v617_v14  ;;  %v221_v2 = vsel %vm175_vm2, %v205_v35, 0.0 }
 0x180   :  { %v405_v46 = vadd.f32 %v389_v6, %v196_v23  ;;  %v204_v6 = vand.u32 2147483647, %v188_v27 }
 0x181   :  { %v206_v53 = vand.u32 2147483647, %v190_v44 }
 0x182   :  { %v348_v34 = vpop.permute.xlu1 %347  ;;  %v425_v58 = vsel %vm417_vm4, %v405_v46, 0.0 }
 0x183   :  { %v390_v9 = vsel %vm224_vm3, %v348_v34, 0.0  ;;  %v426_v5 = vadd.f32 %v425_v58, %v424_v63 }
 0x184   :  { %v406_v0 = vadd.f32 %v390_v9, %v213_v7  ;;  %v73_v7 = vsel %vm57_vm1, %v54_v22, %v46_v21 }
 0x185   :  { %v191_v46 = vsub.f32 %v73_v7, %v619_v15 }
 0x186   :  { %v350_v42 = vpop.permute.xlu0 %349  ;;  %v427_v18 = vsel %vm417_vm4, %v406_v0, 0.0 }
 0x187   :  { %v391_v51 = vsel %vm224_vm3, %v350_v42, 0.0  ;;  %v428_v28 = vadd.f32 %v427_v18, %v426_v5  ;;  %v207_v14 = vand.u32 2147483647, %v191_v46 }
 0x188   :  { %v407_v59 = vadd.f32 %v391_v51, %v198_v40 }
 0x189   :  { %v223_v58 = vsel %vm175_vm2, %v207_v14, 0.0 }
 0x18a   :  { %v352_v47 = vpop.permute.xlu1 %351  ;;  %v429_v23 = vsel %vm417_vm4, %v407_v59, 0.0 }
 0x18b   :  { %v392_v3 = vsel %vm224_vm3, %v352_v47, 0.0  ;;  %v430_v32 = vadd.f32 %v429_v23, %v428_v28 }
 0x18c   :  { %v408_v19 = vadd.f32 %v392_v3, %v215_v56 }
 0x18e   :  { %v354_v54 = vpop.permute.xlu0 %353  ;;  %v431_v13 = vsel %vm417_vm4, %v408_v19, 0.0 }
 0x18f   :  { %v393_v11 = vsel %vm224_vm3, %v354_v54, 0.0  ;;  %v432_v40 = vadd.f32 %v431_v13, %v430_v32 }
 0x190   :  { %v409_v24 = vadd.f32 %v393_v11, %v200_v60 }
 0x192   :  { %v356_v61 = vpop.permute.xlu1 %355  ;;  %v433_v12 = vsel %vm417_vm4, %v409_v24, 0.0 }
 0x193   :  { %v394_v10 = vsel %vm224_vm3, %v356_v61, 0.0  ;;  %v434_v45 = vadd.f32 %v433_v12, %v432_v40 }
 0x194   :  { %v410_v30 = vadd.f32 %v394_v10, %v217_v16 }
 0x196   :  { %v358_v1 = vpop.permute.xlu0 %357  ;;  %v435_v9 = vsel %vm417_vm4, %v410_v30, 0.0 }
 0x197   :  { %v395_v29 = vsel %vm224_vm3, %v358_v1, 0.0  ;;  %v436_v49 = vadd.f32 %v435_v9, %v434_v45 }
 0x198   :  { %v411_v37 = vadd.f32 %v395_v29, %v202_v25 }
 0x19a   :  { %v360_v26 = vpop.permute.xlu1 %359  ;;  %v437_v47 = vsel %vm417_vm4, %v411_v37, 0.0 }
 0x19b   :  { %v396_v34 = vsel %vm224_vm3, %v360_v26, 0.0  ;;  %v438_v8 = vadd.f32 %v437_v47, %v436_v49 }
 0x19c   :  { %v412_v43 = vadd.f32 %v396_v34, %v219_v31 }
 0x19e   :  { %v362_v39 = vpop.permute.xlu0 %361  ;;  %v439_v51 = vsel %vm417_vm4, %v412_v43, 0.0 }
 0x19f   :  { %v397_v42 = vsel %vm224_vm3, %v362_v39, 0.0  ;;  %v440_v55 = vadd.f32 %v439_v51, %v438_v8 }
 0x1a0   :  { %v413_v48 = vadd.f32 %v397_v42, %v204_v6 }
 0x1a2   :  { %v364_v33 = vpop.permute.xlu1 %363  ;;  %v441_v0 = vsel %vm417_vm4, %v413_v48, 0.0 }
 0x1a3   :  { %v398_v50 = vsel %vm224_vm3, %v364_v33, 0.0  ;;  %v442_v57 = vadd.f32 %v441_v0, %v440_v55 }
 0x1a4   :  { %v414_v52 = vadd.f32 %v398_v50, %v221_v2 }
 0x1a6   :  { %v366_v54 = vpop.permute.xlu0 %365  ;;  %v443_v56 = vsel %vm417_vm4, %v414_v52, 0.0 }
 0x1a7   :  { %v399_v15 = vsel %vm224_vm3, %v366_v54, 0.0  ;;  %v444_v61 = vadd.f32 %v443_v56, %v442_v57 }
 0x1a8   :  { %v415_v3 = vadd.f32 %v399_v15, %v206_v53 }
 0x1aa   :  { %v445_v59 = vsel %vm417_vm4, %v415_v3, 0.0  ;;  %v368_v60 = vpop.permute.xlu1 %367 }
 0x1ab   :  { %v400_v62 = vsel %vm224_vm3, %v368_v60, 0.0  ;;  %v446_v11 = vadd.f32 %v445_v59, %v444_v61 }
 0x1ac   :  { %v416_v63 = vadd.f32 %v400_v62, %v223_v58 }
 0x1ae   :  { %v447_v16 = vsel %vm417_vm4, %v416_v63, 0.0 }
 0x1af   :  { %v448_v17 = vadd.f32 %v447_v16, %v446_v11 }
 0x1b1   :  { %449 = vadd.xlane.f32.xlu0 %v448_v17 }
 0x23e   :  { %v450_v18 = vpop.xlane.xlu0 %449 }
 0x23f   :  { %v451_v19 = vrot.slane %v450_v18, 4 }
 0x241   :  { %v452_v1 = vadd.f32 %v451_v19, %v450_v18 }
 0x243   :  { %v453_v20 = vrot.slane %v452_v1, 2 }
 0x245   :  { %v454_v4 = vadd.f32 %v453_v20, %v452_v1 }
 0x247   :  { %v455_v38 = vrot.slane %v454_v4, 1 }
 0x249   :  { %v456_v5 = vadd.f32 %v455_v38, %v454_v4 }
 0x24b   :  { %475 = vpush %v456_v5 }
 0x27c   :  { %s476_s24 = spop %475 }
 0x27d   :  { %v458_v41 = vstv %s476_s24 }
 0x27e   :  { %459 = vst [vmem:[#allocation5] sm:$0xff] %v458_v41 }
 0x27f   :  { %517 = shalt.err (!%p514_p12)
}
 0x280   :  { %s518_s28 = scalar_lea.hbm %s904_s1, 128 }
 0x281   :  { %p519_p13 = scmp.ne.s32.totalorder %s904_s1, %s518_s28  ;;  %p522_p0 = scmp.lt.u32.totalorder %s518_s28, %s904_s1 }
 0x283   :  { %p524_p1 = pnand %p522_p0, %p519_p13 }
 0x285   :  { %527 = shalt.err (!%p524_p1)
}
 0x286   :  { %469 = dma.vmem_to_hbm [thread:$0]  %s467_s23, 128, %s904_s1, [#allocation4]  }
 0x287   :  { %530 = dma.done.wait [#allocation4], 128  }
 0x288   :  { %531 = vsyncadd [#allocation4], 4294967168 }
 0x289   :  { %473 = vsyncpa [#allocation3], 1 }
 0x28a   :  { %474 = vsyncpa [#allocation4], 1 }

</bundles_post_ra>
